<compile_context>
chip_gen: v7x
topology: tpu7x:2x2x1
jax: 0.10.0
libtpu: 0.0.40
codegen_flags: <defaults>
</compile_context>

<pallas_src>
import functools

import jax
import jax.numpy as jnp
from jax.experimental import pallas as pl
from jax.experimental.pallas import tpu as pltpu


def _round_up(a, b):
    return ((a + b - 1) // b) * b


# ----------------------------------------------------------------------------
# Pallas kernel: fused dual-task  enc-chunk -> merge -> fc (accumulate)
# ----------------------------------------------------------------------------
def _fused_dual_head_kernel(x1_ref, x2_ref, w1_ref, w2_ref,
                            wfc1_ref, wfc2_ref, bfc1_ref, bfc2_ref,
                            h1_ref, h2_ref, acc1_ref, acc2_ref, *, additive):
    """Grid = (M tiles [parallel], V chunks [reduction, innermost]).

    Per (i, k):
      lm1_x1 = x1 @ enc1_w[:, k] ; lm2_x1 = x1 @ enc2_w[:, k]   (bf16 MXU)
      lm1_x2 = x2 @ enc1_w[:, k] ; lm2_x2 = x2 @ enc2_w[:, k]
      acc1 += merge(lm1_x1, lm2_x1) @ W_fc1[k, :]
      acc2 += merge(lm1_x2, lm2_x2) @ W_fc2[k, :]
    At the last k: add the fc biases and store the lane-dense [tm, S_pad] fc
    outputs (classifier heads run outside the kernel).
    """
    k = pl.program_id(1)

    @pl.when(k == 0)
    def _():
        acc1_ref[...] = jnp.zeros_like(acc1_ref)
        acc2_ref[...] = jnp.zeros_like(acc2_ref)

    x1 = x1_ref[...]                       # [tm, H]  bf16
    x2 = x2_ref[...]                       # [tm, H]  bf16
    w1 = w1_ref[...]                       # [H, tk]  bf16
    w2 = w2_ref[...]                       # [H, tk]  bf16

    # Native bf16 x bf16 MXU matmuls with f32 accumulation.
    lm1_x1 = jnp.dot(x1, w1, preferred_element_type=jnp.float32)   # [tm, tk]
    lm2_x1 = jnp.dot(x1, w2, preferred_element_type=jnp.float32)
    lm1_x2 = jnp.dot(x2, w1, preferred_element_type=jnp.float32)
    lm2_x2 = jnp.dot(x2, w2, preferred_element_type=jnp.float32)

    # merging_type (elementwise merge kept in f32; cast once for the fc dot).
    if additive:
        r1 = lm1_x1 + lm2_x1
        r2 = lm1_x2 + lm2_x2
    else:
        r1 = lm1_x1 * lm2_x1
        r2 = lm1_x2 * lm2_x2

    # Dropout(p=0.5) == identity in eval mode.
    acc1_ref[...] += jnp.dot(r1.astype(jnp.bfloat16), wfc1_ref[...],
                             preferred_element_type=jnp.float32)
    acc2_ref[...] += jnp.dot(r2.astype(jnp.bfloat16), wfc2_ref[...],
                             preferred_element_type=jnp.float32)

    @pl.when(k == pl.num_programs(1) - 1)
    def _():
        h1_ref[...] = acc1_ref[...] + bfc1_ref[...]     # [tm, S1_pad] f32
        h2_ref[...] = acc2_ref[...] + bfc2_ref[...]     # [tm, S2_pad] f32


def _pick_tiles(M, H, s_pads, V, tm, tk, vmem_budget_bytes):
    """Clip requested tiles to the problem and to a VMEM budget."""
    Mp8 = _round_up(M, 8)
    tm_eff = min(tm, Mp8)
    # Keep >= 2 M tiles on big problems so the "parallel" axis shards across
    # v7x's 2 TensorCores (v5e/v6e are single-TC; harmless there).
    if Mp8 > 512 and tm_eff * 2 > Mp8:
        tm_eff = _round_up((Mp8 + 1) // 2, 8)
    tk_eff = min(tk, _round_up(V, 128))

    def est(tm_e, tk_e):
        bufs = 2  # double buffering per BlockSpec
        x_bytes = 2 * bufs * tm_e * H * 2                 # x1 + x2 (bf16)
        enc_bytes = 2 * bufs * H * tk_e * 2               # enc1 + enc2 chunks
        fc_bytes = bufs * tk_e * sum(s_pads) * 2          # fc1 + fc2 chunks
        out_bytes = bufs * tm_e * sum(s_pads) * 4         # h1 + h2 outputs
        acc_bytes = tm_e * sum(s_pads) * 4                # accumulators
        return x_bytes + enc_bytes + fc_bytes + out_bytes + acc_bytes

    while est(tm_eff, tk_eff) > vmem_budget_bytes and tk_eff > 256:
        tk_eff = max(256, _round_up(tk_eff // 2, 128))
    while est(tm_eff, tk_eff) > vmem_budget_bytes and tm_eff > 256:
        tm_eff = max(256, _round_up(tm_eff // 2, 8))
    return tm_eff, tk_eff


def fused_dual_task_head(x1, x2, enc1_w, enc2_w, fc1_w, fc1_b, fc2_w, fc2_b,
                         *, additive, tm=1024, tk=2048,
                         vmem_budget_bytes=40 * 1024 * 1024,
                         vmem_limit_bytes=48 * 1024 * 1024):
    """x1: [M1, H], x2: [M2, H] features.  enc*_w: [H, V] bf16.
    fc*_w: [V, S*] bf16, fc*_b: [1, S*] f32.

    Returns (h1 [M1, S1], h2 [M2, S2]) f32 fc outputs (pre-classifier).
    """
    M1, H = x1.shape
    M2, _ = x2.shape
    V, S1 = fc1_w.shape
    _, S2 = fc2_w.shape
    assert enc1_w.shape == (H, V) and enc2_w.shape == (H, V)

    # Lane-dense fc/accumulator dimension.
    S1p = _round_up(S1, 128)
    S2p = _round_up(S2, 128)

    M = max(M1, M2)
    tm_eff, tk_eff = _pick_tiles(M, H, (S1p, S2p), V, tm, tk,
                                 vmem_budget_bytes)
    Mp = _round_up(M, tm_eff)
    Vp = _round_up(V, tk_eff)

    # bf16 feed for the MXU; zero-padded rows / vocab columns contribute
    # nothing to the reduction, so results are unchanged.
    x1p = jnp.pad(x1, ((0, Mp - M1), (0, 0))).astype(jnp.bfloat16)
    x2p = jnp.pad(x2, ((0, Mp - M2), (0, 0))).astype(jnp.bfloat16)
    if Vp != V:
        enc1_w = jnp.pad(enc1_w, ((0, 0), (0, Vp - V)))
        enc2_w = jnp.pad(enc2_w, ((0, 0), (0, Vp - V)))
    fc1_wp = jnp.pad(fc1_w, ((0, Vp - V), (0, S1p - S1)))
    fc2_wp = jnp.pad(fc2_w, ((0, Vp - V), (0, S2p - S2)))
    fc1_bp = jnp.pad(fc1_b, ((0, 0), (0, S1p - S1)))
    fc2_bp = jnp.pad(fc2_b, ((0, 0), (0, S2p - S2)))

    kernel = functools.partial(_fused_dual_head_kernel, additive=additive)
    h1, h2 = pl.pallas_call(
        kernel,
        out_shape=(jax.ShapeDtypeStruct((Mp, S1p), jnp.float32),
                   jax.ShapeDtypeStruct((Mp, S2p), jnp.float32)),
        grid_spec=pltpu.PrefetchScalarGridSpec(
            num_scalar_prefetch=0,
            grid=(Mp // tm_eff, Vp // tk_eff),       # (M parallel, V reduce)
            in_specs=[
                pl.BlockSpec((tm_eff, H), lambda i, k: (i, 0)),    # x1 tile
                pl.BlockSpec((tm_eff, H), lambda i, k: (i, 0)),    # x2 tile
                pl.BlockSpec((H, tk_eff), lambda i, k: (0, k)),    # enc1 chunk
                pl.BlockSpec((H, tk_eff), lambda i, k: (0, k)),    # enc2 chunk
                pl.BlockSpec((tk_eff, S1p), lambda i, k: (k, 0)),  # W_fc1
                pl.BlockSpec((tk_eff, S2p), lambda i, k: (k, 0)),  # W_fc2
                pl.BlockSpec((1, S1p), lambda i, k: (0, 0)),       # b_fc1
                pl.BlockSpec((1, S2p), lambda i, k: (0, 0)),       # b_fc2
            ],
            out_specs=[
                pl.BlockSpec((tm_eff, S1p), lambda i, k: (i, 0)),
                pl.BlockSpec((tm_eff, S2p), lambda i, k: (i, 0)),
            ],
            scratch_shapes=[pltpu.VMEM((tm_eff, S1p), jnp.float32),
                            pltpu.VMEM((tm_eff, S2p), jnp.float32)],
        ),
        compiler_params=pltpu.CompilerParams(
            dimension_semantics=("parallel", "arbitrary"),
            vmem_limit_bytes=vmem_limit_bytes),
    )(x1p, x2p, enc1_w, enc2_w, fc1_wp, fc2_wp, fc1_bp, fc2_bp)

    return h1[:M1, :S1], h2[:M2, :S2]


# ----------------------------------------------------------------------------
# MultiTaskModel (JAX wrapper around the fused Pallas dual-task head)
# ----------------------------------------------------------------------------
class MultiTaskModelPallas:
    def __init__(self, key, *, hidden, vocab, num_labels, sequence_lengths,
                 merging_type):
        self.n_labels_task1, self.n_labels_task2 = num_labels
        self.seq_len_1, self.seq_len_2 = sequence_lengths
        self.merging_type = merging_type
        self.vocab = vocab
        self.hidden = hidden

        ks = jax.random.split(key, 8)
        init = lambda k, shape: (jax.random.normal(k, shape, jnp.float32)
                                 * 0.02)
        # Encoder stubs: dense feature [B, L, H] -> logits [B, L, V].
        # TODO(synk): real HF encoders are external models; stubbed as linear.
        self.enc1_w = init(ks[0], (hidden, vocab)).astype(jnp.bfloat16)
        self.enc2_w = init(ks[1], (hidden, vocab)).astype(jnp.bfloat16)
        # fc1 / fc2: vocab -> seq_len   (weights stored [in, out], bf16)
        self.fc1_w = init(ks[2], (vocab, self.seq_len_1)).astype(jnp.bfloat16)
        self.fc1_b = init(ks[3], (1, self.seq_len_1))
        self.fc2_w = init(ks[4], (vocab, self.seq_len_2)).astype(jnp.bfloat16)
        self.fc2_b = init(ks[5], (1, self.seq_len_2))
        # classifiers: seq_len -> n_labels (tiny, f32, applied outside kernel)
        self.cls1_w = init(ks[6], (self.seq_len_1, self.n_labels_task1))
        self.cls1_b = jnp.zeros((1, self.n_labels_task1), jnp.float32)
        self.cls2_w = init(ks[7], (self.seq_len_2, self.n_labels_task2))
        self.cls2_b = jnp.zeros((1, self.n_labels_task2), jnp.float32)

    def __call__(self, x1, x2, *, tm=1024, tk=2048):
        B1, L1, H = x1.shape
        B2, L2, _ = x2.shape
        additive = (self.merging_type == 'additive')

        xf1 = x1.reshape(B1 * L1, H)
        xf2 = x2.reshape(B2 * L2, H)

        # Fused hot path: both encoders -> merge -> fc (both tasks, one call).
        h1, h2 = fused_dual_task_head(
            xf1, xf2, self.enc1_w, self.enc2_w,
            self.fc1_w, self.fc1_b, self.fc2_w, self.fc2_b,
            additive=additive, tm=tm, tk=tk)

        # Tiny classifier heads (S -> C, C = 4..6) in plain JAX; keeping them
        # out of the kernel avoids masked C-wide stores.
        t1 = h1 @ self.cls1_w + self.cls1_b
        t2 = h2 @ self.cls2_w + self.cls2_b

        t1 = t1.reshape(B1, L1, self.n_labels_task1)
        t2 = t2.reshape(B2, L2, self.n_labels_task2)
        # .transpose(1, 2) in PyTorch -> [B, n_labels, L]
        return jnp.transpose(t1, (0, 2, 1)), jnp.transpose(t2, (0, 2, 1))

    # Pure-JAX reference for verification.  Uses the same quantization points
    # as the kernel (bf16 weights, bf16 x feed, bf16 merged feed to fc) but
    # all arithmetic in f32.
    def reference(self, x1, x2):
        q = lambda a: a.astype(jnp.bfloat16).astype(jnp.float32)
        e1 = self.enc1_w.astype(jnp.float32)
        e2 = self.enc2_w.astype(jnp.float32)
        x1q, x2q = q(x1), q(x2)
        l1_x1 = jnp.einsum('blh,hv->blv', x1q, e1)
        l1_x2 = jnp.einsum('blh,hv->blv', x2q, e1)
        l2_x1 = jnp.einsum('blh,hv->blv', x1q, e2)
        l2_x2 = jnp.einsum('blh,hv->blv', x2q, e2)
        if self.merging_type == 'additive':
            r1 = l1_x1 + l2_x1
            r2 = l1_x2 + l2_x2
        else:
            r1 = l1_x1 * l2_x1
            r2 = l1_x2 * l2_x2
        h1 = q(r1) @ self.fc1_w.astype(jnp.float32) + self.fc1_b[0]
        h2 = q(r2) @ self.fc2_w.astype(jnp.float32) + self.fc2_b[0]
        p1 = h1 @ self.cls1_w + self.cls1_b[0]
        p2 = h2 @ self.cls2_w + self.cls2_b[0]
        return jnp.transpose(p1, (0, 2, 1)), jnp.transpose(p2, (0, 2, 1))


def _check_close(got, want, name, rel_tol=1e-2):
    err = float(jnp.max(jnp.abs(got - want)))
    scale = float(jnp.max(jnp.abs(want))) + 1e-6
    assert err <= rel_tol * scale + 1e-5, (
        f"{name}: max abs err {err} vs scale {scale}")


# ----------------------------------------------------------------------------
if __name__ == "__main__":
    # Small shapes consistent with the module's forward (real vocab is 250002;
    # scaled down here).  V=640 is NOT a multiple of tk=256 -> exercises the
    # padded remainder chunk; tm=8 with M=16 exercises the parallel M tiling;
    # S=16 exercises the lane padding to 128.
    B, L, H, V = 2, 8, 32, 640
    seq_len_1, seq_len_2 = 16, 16
    n_labels_1, n_labels_2 = 4, 6

    key = jax.random.PRNGKey(0)
    k_model, k_x1, k_x2 = jax.random.split(key, 3)

    x1 = jax.random.normal(k_x1, (B, L, H), jnp.float32)
    x2 = jax.random.normal(k_x2, (B, L, H), jnp.float32)

    for merging in ('additive', 'multiplicative'):
        model = MultiTaskModelPallas(
            k_model, hidden=H, vocab=V,
            num_labels=(n_labels_1, n_labels_2),
            sequence_lengths=(seq_len_1, seq_len_2),
            merging_type=merging)

        # Small explicit tiles (padding paths) ...
        t1, t2 = model(x1, x2, tm=8, tk=256)
        jax.block_until_ready((t1, t2))
        assert t1.shape == (B, n_labels_1, L), t1.shape
        assert t2.shape == (B, n_labels_2, L), t2.shape

        r1, r2 = model.reference(x1, x2)
        _check_close(t1, r1, f"task1[{merging},small-tiles]")
        _check_close(t2, r2, f"task2[{merging},small-tiles]")

        # ... and the default (large-tile, clamped) configuration.
        t1d, t2d = model(x1, x2)
        jax.block_until_ready((t1d, t2d))
        _check_close(t1d, r1, f"task1[{merging},default-tiles]")
        _check_close(t2d, r2, f"task2[{merging},default-tiles]")

    print("KERNEL_OK")
</pallas_src>

<mosaic_0001>
module attributes {stable_mosaic.version = 11 : i64} {
  func.func @_fused_dual_head_kernel(%arg0: i32, %arg1: i32, %arg2: memref<8x32xbf16, #tpu.memory_space<vmem>>, %arg3: memref<8x32xbf16, #tpu.memory_space<vmem>>, %arg4: memref<32x256xbf16, #tpu.memory_space<vmem>>, %arg5: memref<32x256xbf16, #tpu.memory_space<vmem>>, %arg6: memref<256x128xbf16, #tpu.memory_space<vmem>>, %arg7: memref<256x128xbf16, #tpu.memory_space<vmem>>, %arg8: memref<1x128xf32, #tpu.memory_space<vmem>>, %arg9: memref<1x128xf32, #tpu.memory_space<vmem>>, %arg10: memref<8x128xf32, #tpu.memory_space<vmem>>, %arg11: memref<8x128xf32, #tpu.memory_space<vmem>>, %arg12: memref<8x128xf32, #tpu.memory_space<vmem>>, %arg13: memref<8x128xf32, #tpu.memory_space<vmem>>) attributes {dimension_semantics = [#tpu.dimension_semantics<parallel>, #tpu.dimension_semantics<arbitrary>], iteration_bounds = array<i64: 2, 3>, scalar_prefetch = 0 : i64, scratch_operands = 2 : i64, tpu.core_type = #tpu.core_type<tc>, window_params = [{transform_indices = @transform_0, window_bounds = array<i64: 8, 32>}, {transform_indices = @transform_1, window_bounds = array<i64: 8, 32>}, {transform_indices = @transform_2, window_bounds = array<i64: 32, 256>}, {transform_indices = @transform_3, window_bounds = array<i64: 32, 256>}, {transform_indices = @transform_4, window_bounds = array<i64: 256, 128>}, {transform_indices = @transform_5, window_bounds = array<i64: 256, 128>}, {pipeline_mode = #tpu.pipeline_mode<synchronous>, transform_indices = @transform_6, window_bounds = array<i64: 1, 128>}, {pipeline_mode = #tpu.pipeline_mode<synchronous>, transform_indices = @transform_7, window_bounds = array<i64: 1, 128>}, {transform_indices = @transform_8, window_bounds = array<i64: 8, 128>}, {transform_indices = @transform_9, window_bounds = array<i64: 8, 128>}]} {
    %c0_i32 = arith.constant 0 : i32
    %0 = arith.cmpi eq, %arg1, %c0_i32 : i32
    %1 = arith.extui %0 : i1 to i32
    %c0_i32_0 = arith.constant 0 : i32
    %2 = arith.cmpi ne, %1, %c0_i32_0 : i32
    scf.if %2 {
      %cst_26 = arith.constant 0.000000e+00 : f32
      %28 = vector.broadcast %cst_26 : f32 to vector<8x128xf32>
      %c0_27 = arith.constant 0 : index
      %c0_28 = arith.constant 0 : index
      %29 = vector.load %arg12[%c0_27, %c0_28] : memref<8x128xf32, #tpu.memory_space<vmem>>, vector<8x128xf32>
      tpu.vector_store %arg12[%c0_27, %c0_28], %28 {strides = array<i32>} : memref<8x128xf32, #tpu.memory_space<vmem>>, vector<8x128xf32>,
      %cst_29 = arith.constant 0.000000e+00 : f32
      %30 = vector.broadcast %cst_29 : f32 to vector<8x128xf32>
      %c0_30 = arith.constant 0 : index
      %c0_31 = arith.constant 0 : index
      %31 = vector.load %arg13[%c0_30, %c0_31] : memref<8x128xf32, #tpu.memory_space<vmem>>, vector<8x128xf32>
      tpu.vector_store %arg13[%c0_30, %c0_31], %30 {strides = array<i32>} : memref<8x128xf32, #tpu.memory_space<vmem>>, vector<8x128xf32>,
    } else {
    }
    %c0 = arith.constant 0 : index
    %c0_1 = arith.constant 0 : index
    %3 = vector.load %arg2[%c0, %c0_1] : memref<8x32xbf16, #tpu.memory_space<vmem>>, vector<8x32xbf16>
    %c0_2 = arith.constant 0 : index
    %c0_3 = arith.constant 0 : index
    %4 = vector.load %arg3[%c0_2, %c0_3] : memref<8x32xbf16, #tpu.memory_space<vmem>>, vector<8x32xbf16>
    %c0_4 = arith.constant 0 : index
    %c0_5 = arith.constant 0 : index
    %5 = vector.load %arg4[%c0_4, %c0_5] : memref<32x256xbf16, #tpu.memory_space<vmem>>, vector<32x256xbf16>
    %c0_6 = arith.constant 0 : index
    %c0_7 = arith.constant 0 : index
    %6 = vector.load %arg5[%c0_6, %c0_7] : memref<32x256xbf16, #tpu.memory_space<vmem>>, vector<32x256xbf16>
    %cst = arith.constant dense<0.000000e+00> : vector<8x256xf32>
    %7 = tpu.matmul %3, %5, %cst {dimension_numbers = #tpu.dot_dimension_numbers<[1], [0], [0], [1], [0, 0, 1, 1], [], []>} : vector<8x32xbf16>, vector<32x256xbf16>, vector<8x256xf32> -> vector<8x256xf32>
    %cst_8 = arith.constant dense<0.000000e+00> : vector<8x256xf32>
    %8 = tpu.matmul %3, %6, %cst_8 {dimension_numbers = #tpu.dot_dimension_numbers<[1], [0], [0], [1], [0, 0, 1, 1], [], []>} : vector<8x32xbf16>, vector<32x256xbf16>, vector<8x256xf32> -> vector<8x256xf32>
    %cst_9 = arith.constant dense<0.000000e+00> : vector<8x256xf32>
    %9 = tpu.matmul %4, %5, %cst_9 {dimension_numbers = #tpu.dot_dimension_numbers<[1], [0], [0], [1], [0, 0, 1, 1], [], []>} : vector<8x32xbf16>, vector<32x256xbf16>, vector<8x256xf32> -> vector<8x256xf32>
    %cst_10 = arith.constant dense<0.000000e+00> : vector<8x256xf32>
    %10 = tpu.matmul %4, %6, %cst_10 {dimension_numbers = #tpu.dot_dimension_numbers<[1], [0], [0], [1], [0, 0, 1, 1], [], []>} : vector<8x32xbf16>, vector<32x256xbf16>, vector<8x256xf32> -> vector<8x256xf32>
    %11 = arith.addf %7, %8 : vector<8x256xf32>
    %12 = arith.addf %9, %10 : vector<8x256xf32>
    %c0_11 = arith.constant 0 : index
    %c0_12 = arith.constant 0 : index
    %13 = vector.load %arg12[%c0_11, %c0_12] : memref<8x128xf32, #tpu.memory_space<vmem>>, vector<8x128xf32>
    %14 = arith.truncf %11 : vector<8x256xf32> to vector<8x256xbf16>
    %c0_13 = arith.constant 0 : index
    %c0_14 = arith.constant 0 : index
    %15 = vector.load %arg6[%c0_13, %c0_14] : memref<256x128xbf16, #tpu.memory_space<vmem>>, vector<256x128xbf16>
    %cst_15 = arith.constant dense<0.000000e+00> : vector<8x128xf32>
    %16 = tpu.matmul %14, %15, %cst_15 {dimension_numbers = #tpu.dot_dimension_numbers<[1], [0], [0], [1], [0, 0, 1, 1], [], []>} : vector<8x256xbf16>, vector<256x128xbf16>, vector<8x128xf32> -> vector<8x128xf32>
    %17 = arith.addf %13, %16 : vector<8x128xf32>
    %c0_16 = arith.constant 0 : index
    %c0_17 = arith.constant 0 : index
    %18 = vector.load %arg12[%c0_16, %c0_17] : memref<8x128xf32, #tpu.memory_space<vmem>>, vector<8x128xf32>
    tpu.vector_store %arg12[%c0_16, %c0_17], %17 {strides = array<i32>} : memref<8x128xf32, #tpu.memory_space<vmem>>, vector<8x128xf32>,
    %c0_18 = arith.constant 0 : index
    %c0_19 = arith.constant 0 : index
    %19 = vector.load %arg13[%c0_18, %c0_19] : memref<8x128xf32, #tpu.memory_space<vmem>>, vector<8x128xf32>
    %20 = arith.truncf %12 : vector<8x256xf32> to vector<8x256xbf16>
    %c0_20 = arith.constant 0 : index
    %c0_21 = arith.constant 0 : index
    %21 = vector.load %arg7[%c0_20, %c0_21] : memref<256x128xbf16, #tpu.memory_space<vmem>>, vector<256x128xbf16>
    %cst_22 = arith.constant dense<0.000000e+00> : vector<8x128xf32>
    %22 = tpu.matmul %20, %21, %cst_22 {dimension_numbers = #tpu.dot_dimension_numbers<[1], [0], [0], [1], [0, 0, 1, 1], [], []>} : vector<8x256xbf16>, vector<256x128xbf16>, vector<8x128xf32> -> vector<8x128xf32>
    %23 = arith.addf %19, %22 : vector<8x128xf32>
    %c0_23 = arith.constant 0 : index
    %c0_24 = arith.constant 0 : index
    %24 = vector.load %arg13[%c0_23, %c0_24] : memref<8x128xf32, #tpu.memory_space<vmem>>, vector<8x128xf32>
    tpu.vector_store %arg13[%c0_23, %c0_24], %23 {strides = array<i32>} : memref<8x128xf32, #tpu.memory_space<vmem>>, vector<8x128xf32>,
    %c2_i32 = arith.constant 2 : i32
    %25 = arith.cmpi eq, %arg1, %c2_i32 : i32
    %26 = arith.extui %25 : i1 to i32
    %c0_i32_25 = arith.constant 0 : i32
    %27 = arith.cmpi ne, %26, %c0_i32_25 : i32
    scf.if %27 {
      %c0_26 = arith.constant 0 : index
      %c0_27 = arith.constant 0 : index
      %28 = vector.load %arg12[%c0_26, %c0_27] : memref<8x128xf32, #tpu.memory_space<vmem>>, vector<8x128xf32>
      %c0_28 = arith.constant 0 : index
      %c0_29 = arith.constant 0 : index
      %29 = vector.load %arg8[%c0_28, %c0_29] : memref<1x128xf32, #tpu.memory_space<vmem>>, vector<1x128xf32>
      %30 = vector.broadcast %29 : vector<1x128xf32> to vector<8x128xf32>
      %31 = arith.addf %28, %30 : vector<8x128xf32>
      %c0_30 = arith.constant 0 : index
      %c0_31 = arith.constant 0 : index
      %32 = vector.load %arg10[%c0_30, %c0_31] : memref<8x128xf32, #tpu.memory_space<vmem>>, vector<8x128xf32>
      tpu.vector_store %arg10[%c0_30, %c0_31], %31 {strides = array<i32>} : memref<8x128xf32, #tpu.memory_space<vmem>>, vector<8x128xf32>,
      %c0_32 = arith.constant 0 : index
      %c0_33 = arith.constant 0 : index
      %33 = vector.load %arg13[%c0_32, %c0_33] : memref<8x128xf32, #tpu.memory_space<vmem>>, vector<8x128xf32>
      %c0_34 = arith.constant 0 : index
      %c0_35 = arith.constant 0 : index
      %34 = vector.load %arg9[%c0_34, %c0_35] : memref<1x128xf32, #tpu.memory_space<vmem>>, vector<1x128xf32>
      %35 = vector.broadcast %34 : vector<1x128xf32> to vector<8x128xf32>
      %36 = arith.addf %33, %35 : vector<8x128xf32>
      %c0_36 = arith.constant 0 : index
      %c0_37 = arith.constant 0 : index
      %37 = vector.load %arg11[%c0_36, %c0_37] : memref<8x128xf32, #tpu.memory_space<vmem>>, vector<8x128xf32>
      tpu.vector_store %arg11[%c0_36, %c0_37], %36 {strides = array<i32>} : memref<8x128xf32, #tpu.memory_space<vmem>>, vector<8x128xf32>,
    } else {
    }
    return
  }
  func.func @transform_0(%arg0: i32, %arg1: i32) -> (i32, i32) {
    %c0_i32 = arith.constant 0 : i32
    %c0_i32_0 = arith.constant 0 : i32
    return %arg0, %c0_i32 : i32, i32
  }
  func.func @transform_1(%arg0: i32, %arg1: i32) -> (i32, i32) {
    %c0_i32 = arith.constant 0 : i32
    %c0_i32_0 = arith.constant 0 : i32
    return %arg0, %c0_i32 : i32, i32
  }
  func.func @transform_2(%arg0: i32, %arg1: i32) -> (i32, i32) {
    %c0_i32 = arith.constant 0 : i32
    %c0_i32_0 = arith.constant 0 : i32
    return %c0_i32, %arg1 : i32, i32
  }
  func.func @transform_3(%arg0: i32, %arg1: i32) -> (i32, i32) {
    %c0_i32 = arith.constant 0 : i32
    %c0_i32_0 = arith.constant 0 : i32
    return %c0_i32, %arg1 : i32, i32
  }
  func.func @transform_4(%arg0: i32, %arg1: i32) -> (i32, i32) {
    %c0_i32 = arith.constant 0 : i32
    %c0_i32_0 = arith.constant 0 : i32
    return %arg1, %c0_i32 : i32, i32
  }
  func.func @transform_5(%arg0: i32, %arg1: i32) -> (i32, i32) {
    %c0_i32 = arith.constant 0 : i32
    %c0_i32_0 = arith.constant 0 : i32
    return %arg1, %c0_i32 : i32, i32
  }
  func.func @transform_6(%arg0: i32, %arg1: i32) -> (i32, i32) {
    %c0_i32 = arith.constant 0 : i32
    %c0_i32_0 = arith.constant 0 : i32
    %c0_i32_1 = arith.constant 0 : i32
    return %c0_i32, %c0_i32_0 : i32, i32
  }
  func.func @transform_7(%arg0: i32, %arg1: i32) -> (i32, i32) {
    %c0_i32 = arith.constant 0 : i32
    %c0_i32_0 = arith.constant 0 : i32
    %c0_i32_1 = arith.constant 0 : i32
    return %c0_i32, %c0_i32_0 : i32, i32
  }
  func.func @transform_8(%arg0: i32, %arg1: i32) -> (i32, i32) {
    %c0_i32 = arith.constant 0 : i32
    %c0_i32_0 = arith.constant 0 : i32
    return %arg0, %c0_i32 : i32, i32
  }
  func.func @transform_9(%arg0: i32, %arg1: i32) -> (i32, i32) {
    %c0_i32 = arith.constant 0 : i32
    %c0_i32_0 = arith.constant 0 : i32
    return %arg0, %c0_i32 : i32, i32
  }
}

</mosaic_0001>

<bundles_post_ra>
// kernel: tpu_custom_call.1
= control target key start
LH: loop header
LB: loop body
LE: loop exit
PB: predicated region body
PF: predicated region fallthrough
CT: control target
= control target key end

     0   :  { %s2726_s0 = inlined_call_operand.hbm [shape: bf16[16,32], index: 0, kind: input, shape index: {}]   ;;  %s2727_s1 = inlined_call_operand.hbm [shape: bf16[16,32], index: 1, kind: input, shape index: {}]   ;;  %s2728_s2 = inlined_call_operand.hbm [shape: bf16[32,768], index: 2, kind: input, shape index: {}]   ;;  %s2729_s3 = inlined_call_operand.hbm [shape: bf16[32,768], index: 3, kind: input, shape index: {}]   ;;  %s2730_s4 = inlined_call_operand.hbm [shape: bf16[768,128], index: 4, kind: input, shape index: {}]   ;;  %s2731_s5 = inlined_call_operand.hbm [shape: bf16[768,128], index: 5, kind: input, shape index: {}]   ;;  %s2732_s6 = inlined_call_operand.vmem [shape: f32[1,128], index: 6, kind: input, shape index: {}]   ;;  %s2733_s7 = inlined_call_operand.vmem [shape: f32[1,128], index: 7, kind: input, shape index: {}]   ;;  %s2734_s8 = inlined_call_operand.hbm [shape: f32[16,128], index: 8, kind: output, shape index: {0}]   ;;  %s2735_s9 = inlined_call_operand.hbm [shape: f32[16,128], index: 9, kind: output, shape index: {1}]  }
   0x1   :  { %2770 = sst [smem:[#allocation42_spill]] %s2727_s1 }
   0x2   :  { %2771 = sst [smem:[#allocation43_spill]] %s2729_s3 }
   0x3   :  { %2772 = sst [smem:[#allocation44_spill]] %s2732_s6 }
   0x4   :  { %2773 = sst [smem:[#allocation45_spill]] %s2733_s7 }
   0x5   :  { %2774 = sst [smem:[#allocation46_spill]] %s2734_s8 }
   0x6   :  { %2775 = sst [smem:[#allocation47_spill]] %s2735_s9 }
   0x7   :  { %15 = vsyncpa [#allocation5], 0 }
   0x8   :  { %17 = vsyncpa [#allocation5 + $0x1], 0 }
   0x9   :  { %18 = vsyncpa [#allocation8], 0 }
   0xa   :  { %20 = vsyncpa [#allocation8 + $0x1], 0 }
   0xb   :  { %21 = vsyncpa [#allocation11], 0 }
   0xc   :  { %23 = vsyncpa [#allocation11 + $0x1], 0 }
   0xd   :  { %24 = vsyncpa [#allocation14], 0 }
   0xe   :  { %26 = vsyncpa [#allocation14 + $0x1], 0 }
   0xf   :  { %27 = vsyncpa [#allocation6], 0 }
  0x10   :  { %29 = vsyncpa [#allocation6 + $0x1], 0 }
  0x11   :  { %30 = vsyncpa [#allocation17], 0 }
  0x12   :  { %32 = vsyncpa [#allocation17 + $0x1], 0  ;;  %s2157_s30 = smov 0   ;;  %s2159_s10 = smov 0  }
  0x13   :  { %s2161_s11 = smov 0   ;;  %s2163_s12 = smov 0  }
  0x14   :  { %s2165_s13 = smov 0   ;;  %s2167_s14 = smov 0  }
  0x15   :  { %s2169_s15 = smov 0   ;;  %s2171_s16 = smov 0  }
  0x16   :  { %s2173_s17 = smov 0   ;;  %s2175_s18 = smov 0  }
  0x17   :  { %s2177_s19 = smov 0  }
  0x18 LB: > { %2776 = sst [smem:[#allocation25_spill]] %s2054_s10  ;;  %s2213_s20 = sadd.s32 4294967295, %s2090_s19   ;;  %s2090_s19 = sphi %s2177_s19, %s38_s19   ;;  %s2086_s18 = sphi %s2175_s18, %s2848_s18   ;;  %s2082_s17 = sphi %s2173_s17, %s2847_s17   ;;  %s2078_s16 = sphi %s2171_s16, %s2846_s16   ;;  %s2074_s15 = sphi %s2169_s15, %s2845_s15   ;;  %s2070_s14 = sphi %s2167_s14, %s2844_s14   ;;  %s2066_s13 = sphi %s2165_s13, %s2843_s13   ;;  %s2062_s12 = sphi %s2163_s12, %s2839_s12   ;;  %s2058_s11 = sphi %s2161_s11, %s2838_s11   ;;  %s2054_s10 = sphi %s2159_s10, %s2837_s10   ;;  %s2050_s30 = sphi %s2157_s30, %s2836_s30  }
  0x19   : > { %2777 = sst [smem:[#allocation26_spill]] %s2058_s11  ;;  %s1419_s21 = sadd.s32 4294967294, %s2090_s19  }
  0x1a   : > { %2778 = sst [smem:[#allocation27_spill]] %s2062_s12  ;;  %s47_s22 = sadd.s32 1, %s2082_s17 }
  0x1b   : > { %2779 = sst [smem:[#allocation28_spill]] %s2066_s13  ;;  %s50_s23 = sadd.s32 1, %s2086_s18 }
  0x1c   : > { %2780 = sst [smem:[#allocation29_spill]] %s2074_s15  ;;  %p48_p0 = scmp.ge.s32.totalorder %s47_s22, 3 }
  0x1d   : > { %2781 = sst [smem:[#allocation30_spill]] %s2078_s16  ;;  %s57_s24 = sadd.s32 1, %s2070_s14 }
  0x1e   : > { %2782 = sst [smem:[#allocation31_spill]] %s2090_s19  ;;  %p64_p1 = scmp.ne.s32.totalorder %s2070_s14, %s2066_s13 }
  0x1f   : > { %2783 = sst [smem:[#allocation32_spill]] %s2213_s20  ;;  %p65_p2 = scmp.eq.s32.totalorder %s2090_s19, 0 }
  0x20   : > { %s2850_s22 = smov (%p48_p0, %s47_s22), 0  ;;  %s2852_s23 = smov (!%p48_p0, %s50_s23), %s2086_s18 }
  0x21   : > { %2784 = sst [smem:[#allocation33_spill]] %s2850_s22  ;;  %p2230_p3 = por %p65_p2, %p64_p1 }
  0x22   : > { %p2739_p4 = scmp.ne.s32.totalorder %s2066_s13, %s2062_s12  ;;  %p52_p5 = scmp.ge.s32.totalorder %s2852_s23, 2 }
  0x23   : > { %p71_p6 = scmp.eq.s32.totalorder %s2213_s20, 0  ;;  %s106_s26 = ssub.s32 %s2082_s17, %s2850_s22 }
  0x24   : > { %s109_s27 = sadd.s32 1, %s2058_s11  ;;  %s2854_s23 = smov (%p52_p5, %s2852_s23), 0 }
  0x25   : > { %2786 = sst [smem:[#allocation34_spill]] %s2854_s23  ;;  %p2247_p7 = por %p71_p6, %p2739_p4 }
  0x26   : > { %p107_p8 = scmp.eq.s32.totalorder %s106_s26, 0  ;;  %s54_s29 = ssub.s32 %s2086_s18, %s2854_s23 }
  0x27   : > { %s2787_s28 = scalar_select %p2247_p7, 1, 0 }
  0x28   : > { %p116_p9 = scmp.ne.s32.totalorder %s2058_s11, %s2054_s10  ;;  %p55_p10 = scmp.eq.s32.totalorder %s54_s29, 0 }
  0x29   : > { %2788 = sst [smem:[#allocation35_spill]] %s2787_s28  ;;  %p122_p11 = scmp.ne.s32.totalorder %s2054_s10, %s2050_s30 }
  0x2a   : > { %s2258_s22 = scalar_select %p107_p8, %s2058_s11, %s109_s27  }
  0x2b   : > { %s2261_s9 = scalar_select %p55_p10, %s2070_s14, %s57_s24  }
  0x2c   : > { %2789 = sst [smem:[#allocation36_spill]] %s2258_s22  ;;  %p2265_p12 = por %p116_p9, %p65_p2 }
  0x2d   : > { %2790 = sst [smem:[#allocation37_spill]] %s2261_s9  ;;  %p2271_p13 = por %p122_p11, %p71_p6 }
  0x2e   : > { %p266_p0 = scmp.eq.s32.totalorder %s2213_s20, 5  ;;  %p272_p5 = scmp.eq.s32.totalorder %s1419_s21, 5 }
  0x2f   : > { %s2792_s26 = scalar_select %p2271_p13, 1, 0 }
  0x30   : > { %p1599_p4 = scmp.lt.s32.totalorder %s2090_s19, 6  ;;  %p2280_p8 = por %p266_p0, %p64_p1 }
  0x31   : > { %2793 = sst [smem:[#allocation38_spill]] %s2792_s26  ;;  %p2796_p10 = scmp.ne.s32.totalorder %s2066_s13, %s2062_s12 }
  0x32   : > { %s2794_s30 = scalar_select %p2280_p8, 1, 0 }
  0x33   : > { %p2287_p2 = por %p272_p5, %p2796_p10  ;;  %s2744_s27 = sand.u32 1, %s2070_s14  }
  0x34   : > { %2795 = sst [smem:[#allocation39_spill]] %s2794_s30  ;;  %s2747_s29 = sshll.u32 %s2086_s18, 6 }
  0x35   : > { %s2797_s24 = scalar_select %p2287_p2, 1, 0 }
  0x36   : > { %s2295_s23 = sshll.u32 %s2744_s27, 2  ;;  %p2299_p6 = pnand %p1599_p4, %p2230_p3 }
  0x37   : > { %2798 = sst [smem:[#allocation40_spill]] %s2797_s24  ;;  %s2749_s9 = sand.u32 1, %s2090_s19  }
  0x38   : > { %s2799_s21 = scalar_select %p2299_p6, 1, 0 }
  0x39   : > { %s2800_s1 = sld [smem:[#allocation42_spill]]  ;;  %s346_s27 = scalar_lea.vmem [#allocation7], %s2295_s23 }
  0x3a   : > { %s353_s25 = sshll.u32 %s346_s27, 4  ;;  %p2316_p1 = pnand %p1599_p4, %p2265_p12  ;;  %s2312_s25 = int_to_ptr.vmem [resolvable:$true] %s353_s25 }
  0x3b   : > { %s2322_s16 = scalar_lea.sflag [#allocation8], %s2749_s9  ;;  %p2756_p9 = pneg %p2299_p6 }
  0x3c   : > { %s2801_s24 = scalar_select %p2316_p1, 1, 0 }
  0x3f   : > { %s2309_s30 = scalar_lea.hbm %s2800_s1, %s2747_s29  ;;  %s1745_s27 = scalar_lea.hbm %s2800_s1, 128 }
  0x40   : > { %s1740_s7 = scalar_lea.hbm %s2309_s30, 64  ;;  %p1746_p4 = scmp.lt.u32.totalorder %s2309_s30, %s2800_s1 }
  0x41   : > { %p1741_p3 = scmp.ne.s32.totalorder %s2309_s30, %s1740_s7  ;;  %p1747_p12 = scmp.lt.u32.totalorder %s1745_s27, %s1740_s7 }
  0x42   : > { %p1749_p10 = scmp.lt.u32.totalorder %s1740_s7, %s2309_s30 }
  0x43   : > { %p1743_p11 = pnand %p2756_p9, %p1741_p3  ;;  %p1748_p5 = por %p1747_p12, %p1746_p4 }
  0x45   : > { %p1744_p0 = pneg %p1743_p11  ;;  %p1750_p2 = por %p1749_p10, %p1748_p5 }
  0x47   : > { %p1751_p8 = pnand %p1750_p2, %p1744_p0 }
  0x49   : > { %1754 = shalt.err (!%p1751_p8)
}
  0x4a   : > { %s1755_s9 = scalar_lea.vmem %s2312_s25, 64  ;;  %s2092_s12 = smov [#allocation7]  }
  0x4b   : > { %p1756_p3 = scmp.ne.s32.totalorder %s2312_s25, %s1755_s9  ;;  %s1760_s22 = sshll.u32 %s2092_s12, 4  ;;  %s1761_s22 = int_to_ptr.vmem [resolvable:$false] %s1760_s22 }
  0x4c   : > { %s1762_s29 = scalar_lea.vmem %s1761_s22, 128  ;;  %p1763_p7 = scmp.lt.s32.totalorder %s2312_s25, %s1761_s22 }
  0x4d   : > { %p1758_p11 = pnand %p1756_p3, %p2756_p9  ;;  %p1764_p4 = scmp.lt.s32.totalorder %s1762_s29, %s1755_s9 }
  0x4f   : > { %p1759_p13 = pneg %p1758_p11  ;;  %p1765_p12 = por %p1764_p4, %p1763_p7 }
  0x51   : > { %p1766_p5 = pnand %p1765_p12, %p1759_p13 }
  0x53   : > { %1769 = shalt.err (!%p1766_p5)
}
  0x54   : > { %1579 = dma.hbm_to_vmem [thread:$0]  (!%p2299_p6), %s2309_s30, 64, %s2312_s25, %s2322_s16  }
  0x55   : > { %p1438_p8 = scmp.ge.s32.totalorder %s2090_s19, 1  ;;  %p442_p2 = scmp.lt.s32.totalorder %s2090_s19, 7 }
  0x56   : > { %s2353_s7 = sand.u32 1, %s2058_s11   ;;  %s1501_s9 = sshll.u32 %s2082_s17, 7 }
  0x57   : > { %p2356_p7 = pnand %p1438_p8, %p442_p2  ;;  %s1426_s8 = sshll.u32 %s2353_s7, 5 }
  0x58   : > { %s2364_s29 = scalar_lea.hbm %s2728_s2, %s1501_s9  ;;  %s364_s1 = scalar_lea.vmem [#allocation9], %s1426_s8 }
  0x59   : > { %s2802_s27 = scalar_select %p2356_p7, 1, 0 }
  0x5a   : > { %s371_s6 = sshll.u32 %s364_s1, 4  ;;  %s2804_s3 = sld [smem:[#allocation43_spill]]  ;;  %s2366_s6 = int_to_ptr.vmem [resolvable:$true] %s371_s6 }
  0x5b   : > { %2803 = sst [smem:[#allocation41_spill]] %s2802_s27  ;;  %s385_s15 = scalar_lea.vmem [#allocation10], %s1426_s8 }
  0x5c   : > { %s392_s26 = sshll.u32 %s385_s15, 4  ;;  %s2805_s12 = sand.u32 1, %s2090_s19   ;;  %s2373_s26 = int_to_ptr.vmem [resolvable:$true] %s392_s26 }
  0x5d   : > { %s2377_s22 = scalar_lea.sflag [#allocation11], %s2805_s12  ;;  %p2383_p0 = pneg %p2316_p1 }
  0x5f   : > { %s2806_s1 = scalar_select %p2383_p0, 1, 0 }
  0x60   : > { %s2371_s11 = scalar_lea.hbm %s2804_s3, %s1501_s9  ;;  %s1775_s15 = scalar_lea.hbm %s2804_s3, 1536 }
  0x61   : > { %s1770_s10 = scalar_lea.hbm %s2371_s11, 512  ;;  %p1776_p11 = scmp.lt.u32.totalorder %s2371_s11, %s2804_s3 }
  0x62   : > { %p1771_p13 = scmp.ne.s32.totalorder %s2371_s11, %s1770_s10  ;;  %p1777_p4 = scmp.lt.u32.totalorder %s1775_s15, %s1770_s10 }
  0x63   : > { %p1779_p5 = scmp.lt.u32.totalorder %s1770_s10, %s2371_s11 }
  0x64   : > { %p1773_p10 = pnand %p2383_p0, %p1771_p13  ;;  %p1778_p12 = por %p1777_p4, %p1776_p11 }
  0x66   : > { %p1774_p3 = pneg %p1773_p10  ;;  %p1780_p8 = por %p1779_p5, %p1778_p12 }
  0x68   : > { %p1781_p2 = pnand %p1780_p8, %p1774_p3 }
  0x6a   : > { %1784 = shalt.err (!%p1781_p2)
}
  0x6b   : > { %s1785_s12 = scalar_lea.vmem %s2373_s26, 512  ;;  %s2093_s9 = smov [#allocation10]  }
  0x6c   : > { %p1786_p13 = scmp.ne.s32.totalorder %s2373_s26, %s1785_s12  ;;  %s1790_s30 = sshll.u32 %s2093_s9, 4  ;;  %s1791_s30 = int_to_ptr.vmem [resolvable:$false] %s1790_s30 }
  0x6d   : > { %s1792_s8 = scalar_lea.vmem %s1791_s30, 1024  ;;  %p1793_p7 = scmp.lt.s32.totalorder %s2373_s26, %s1791_s30 }
  0x6e   : > { %p1788_p10 = pnand %p1786_p13, %p2383_p0  ;;  %p1794_p6 = scmp.lt.s32.totalorder %s1792_s8, %s1785_s12 }
  0x70   : > { %p1789_p9 = pneg %p1788_p10  ;;  %p1795_p11 = por %p1794_p6, %p1793_p7 }
  0x72   : > { %p1796_p4 = pnand %p1795_p11, %p1789_p9 }
  0x74   : > { %1799 = shalt.err (!%p1796_p4)
}
  0x75   : > { %s2094_s10 = smov 384   ;;  %s2095_s15 = smov 128  }
  0x76   : > { %s2096_s25 = smov 8   ;;  %s2807_s12 = sshll.u32 %s2086_s18, 6 }
  0x77   : > { %1585 = dma.hbm_to_vmem [thread:$0]  (!%p2316_p1), %s2371_s11, 512, %s2373_s26, %s2377_s22, %s2094_s10, %s2095_s15, %s2096_s25  }
  0x78   : > { %s2415_s8 = scalar_lea.hbm %s2726_s0, %s2807_s12  ;;  %s328_s3 = scalar_lea.vmem [#allocation4], %s2295_s23 }
  0x79   : > { %s335_s19 = sshll.u32 %s328_s3, 4  ;;  %s1432_s20 = sshll.u32 %s2353_s7, 7  ;;  %s336_s19 = int_to_ptr.vmem [resolvable:$true] %s335_s19 }
  0x7a   : > { %s2808_s28 = sand.u32 1, %s2070_s14   ;;  %s1800_s27 = scalar_lea.hbm %s2415_s8, 64 }
  0x7b   : > { %s325_s13 = scalar_lea.sflag [#allocation5], %s2808_s28  ;;  %p1801_p6 = scmp.ne.s32.totalorder %s2415_s8, %s1800_s27 }
  0x7c   : > { %p2809_p9 = scmp.ne.s32.totalorder %s2799_s21, 0  ;;  %s1805_s12 = scalar_lea.hbm %s2726_s0, 128 }
  0x7d   : > { %p1806_p5 = scmp.lt.u32.totalorder %s2415_s8, %s2726_s0  ;;  %p1807_p8 = scmp.lt.u32.totalorder %s1805_s12, %s1800_s27 }
  0x7e   : > { %p2810_p7 = pneg %p2809_p9  ;;  %p1809_p13 = scmp.lt.u32.totalorder %s1800_s27, %s2415_s8 }
  0x7f   : > { %p1808_p2 = por %p1807_p8, %p1806_p5 }
  0x80   : > { %p1803_p3 = pnand %p1801_p6, %p2810_p7 }
  0x81   : > { %p1810_p10 = por %p1809_p13, %p1808_p2 }
  0x82   : > { %p1804_p12 = pneg %p1803_p3 }
  0x84   : > { %p1811_p11 = pnand %p1810_p10, %p1804_p12 }
  0x86   : > { %1814 = shalt.err (!%p1811_p11)
}
  0x87   : > { %s1815_s3 = scalar_lea.vmem %s336_s19, 64  ;;  %p2811_p6 = pmov %p2810_p7 }
  0x88   : > { %p1816_p4 = scmp.ne.s32.totalorder %s336_s19, %s1815_s3  ;;  %s2097_s23 = smov [#allocation4]  }
  0x89   : > { %s1820_s28 = sshll.u32 %s2097_s23, 4  ;;  %s1821_s28 = int_to_ptr.vmem [resolvable:$false] %s1820_s28 }
  0x8a   : > { %p1818_p7 = pnand %p1816_p4, %p2811_p6  ;;  %s1822_s11 = scalar_lea.vmem %s1821_s28, 128 }
  0x8b   : > { %p1823_p1 = scmp.lt.s32.totalorder %s336_s19, %s1821_s28  ;;  %p1824_p0 = scmp.lt.s32.totalorder %s1822_s11, %s1815_s3 }
  0x8c   : > { %p1819_p3 = pneg %p1818_p7 }
  0x8d   : > { %p1825_p5 = por %p1824_p0, %p1823_p1 }
  0x8f   : > { %p1826_p8 = pnand %p1825_p5, %p1819_p3 }
  0x91   : > { %1829 = shalt.err (!%p1826_p8)
}
  0x92   : > { %1576 = dma.hbm_to_vmem [thread:$0]  (!%p2809_p9), %s2415_s8, 64, %s336_s19, %s325_s13  }
  0x93   : > { %s1830_s27 = scalar_lea.hbm %s2364_s29, 512  ;;  %p2812_p2 = scmp.ne.s32.totalorder %s2806_s1, 0 }
  0x94   : > { %p1831_p12 = scmp.ne.s32.totalorder %s2364_s29, %s1830_s27  ;;  %s1835_s9 = scalar_lea.hbm %s2728_s2, 1536 }
  0x95   : > { %p1836_p1 = scmp.lt.u32.totalorder %s2364_s29, %s2728_s2  ;;  %p1837_p0 = scmp.lt.u32.totalorder %s1835_s9, %s1830_s27 }
  0x96   : > { %p1833_p13 = pnand %p1831_p12, %p2812_p2  ;;  %p1839_p4 = scmp.lt.u32.totalorder %s1830_s27, %s2364_s29 }
  0x97   : > { %p1838_p11 = por %p1837_p0, %p1836_p1 }
  0x98   : > { %p1834_p10 = pneg %p1833_p13 }
  0x99   : > { %p1840_p6 = por %p1839_p4, %p1838_p11 }
  0x9b   : > { %p1841_p7 = pnand %p1840_p6, %p1834_p10 }
  0x9d   : > { %1844 = shalt.err (!%p1841_p7)
}
  0x9e   : > { %s1845_s13 = scalar_lea.vmem %s2366_s6, 512  ;;  %s2098_s19 = smov [#allocation9]  }
  0x9f   : > { %p1846_p9 = scmp.ne.s32.totalorder %s2366_s6, %s1845_s13  ;;  %s1850_s21 = sshll.u32 %s2098_s19, 4  ;;  %s1851_s21 = int_to_ptr.vmem [resolvable:$false] %s1850_s21 }
  0xa0   : > { %s1852_s8 = scalar_lea.vmem %s1851_s21, 1024  ;;  %p1853_p8 = scmp.lt.s32.totalorder %s2366_s6, %s1851_s21 }
  0xa1   : > { %p1848_p3 = pnand %p1846_p9, %p2812_p2  ;;  %p1854_p12 = scmp.lt.s32.totalorder %s1852_s8, %s1845_s13 }
  0xa3   : > { %p1849_p5 = pneg %p1848_p3  ;;  %p1855_p13 = por %p1854_p12, %p1853_p8 }
  0xa5   : > { %p1856_p1 = pnand %p1855_p13, %p1849_p5 }
  0xa7   : > { %1859 = shalt.err (!%p1856_p1)
}
  0xa8   : > { %p2813_p10 = scmp.ne.s32.totalorder %s2801_s24, 0  ;;  %s1503_s23 = sshll.u32 %s2082_s17, 11 }
  0xa9   : > { %s406_s28 = scalar_lea.vmem [#allocation12], %s1432_s20  ;;  %s2473_s12 = scalar_lea.hbm %s2730_s4, %s1503_s23 }
  0xaa   : > { %1582 = dma.hbm_to_vmem [thread:$0]  (!%p2813_p10), %s2364_s29, 512, %s2366_s6, %s2322_s16, %s2094_s10, %s2095_s15, %s2096_s25  }
  0xab   : > { %s413_s11 = sshll.u32 %s406_s28, 4  ;;  %s1860_s9 = scalar_lea.hbm %s2473_s12, 2048  ;;  %s2475_s11 = int_to_ptr.vmem [resolvable:$true] %s413_s11 }
  0xac   : > { %p1861_p0 = scmp.ne.s32.totalorder %s2473_s12, %s1860_s9  ;;  %s1865_s29 = scalar_lea.hbm %s2730_s4, 6144 }
  0xad   : > { %p1866_p6 = scmp.lt.u32.totalorder %s2473_s12, %s2730_s4  ;;  %p1867_p7 = scmp.lt.u32.totalorder %s1865_s29, %s1860_s9 }
  0xae   : > { %p1863_p11 = pnand %p1861_p0, %p2812_p2  ;;  %p1869_p3 = scmp.lt.u32.totalorder %s1860_s9, %s2473_s12 }
  0xaf   : > { %p1868_p9 = por %p1867_p7, %p1866_p6 }
  0xb0   : > { %p1864_p4 = pneg %p1863_p11 }
  0xb1   : > { %p1870_p5 = por %p1869_p3, %p1868_p9 }
  0xb3   : > { %p1871_p8 = pnand %p1870_p5, %p1864_p4 }
  0xb5   : > { %1874 = shalt.err (!%p1871_p8)
}
  0xb6   : > { %s1875_s25 = scalar_lea.vmem %s2475_s11, 2048  ;;  %s2099_s30 = smov [#allocation12]  }
  0xb7   : > { %p1876_p12 = scmp.ne.s32.totalorder %s2475_s11, %s1875_s25  ;;  %s1880_s3 = sshll.u32 %s2099_s30, 4  ;;  %s1881_s3 = int_to_ptr.vmem [resolvable:$false] %s1880_s3 }
  0xb8   : > { %s1882_s13 = scalar_lea.vmem %s1881_s3, 4096  ;;  %p1883_p0 = scmp.lt.s32.totalorder %s2475_s11, %s1881_s3 }
  0xb9   : > { %p1878_p13 = pnand %p1876_p12, %p2812_p2  ;;  %p1884_p11 = scmp.lt.s32.totalorder %s1882_s13, %s1875_s25 }
  0xbb   : > { %p1879_p1 = pneg %p1878_p13  ;;  %p1885_p6 = por %p1884_p11, %p1883_p0 }
  0xbd   : > { %p1886_p7 = pnand %p1885_p6, %p1879_p1 }
  0xbf   : > { %1889 = shalt.err (!%p1886_p7)
}
  0xc0   : > { %s2100_s19 = smov 64   ;;  %s2101_s21 = smov 4  }
  0xc1   : > { %1588 = dma.hbm_to_vmem [thread:$0]  (!%p2813_p10), %s2473_s12, 2048, %s2475_s11, %s2377_s22, %s2100_s19, %s2100_s19, %s2101_s21  }
  0xc2   : > { %s2507_s27 = scalar_lea.hbm %s2731_s5, %s1503_s23  ;;  %s427_s26 = scalar_lea.vmem [#allocation13], %s1432_s20 }
  0xc3   : > { %s434_s9 = sshll.u32 %s427_s26, 4  ;;  %s424_s6 = scalar_lea.sflag [#allocation14], %s2353_s7  ;;  %s2511_s9 = int_to_ptr.vmem [resolvable:$true] %s434_s9 }
  0xc4   : > { %s1890_s16 = scalar_lea.hbm %s2507_s27, 2048  ;;  %s1895_s23 = scalar_lea.hbm %s2731_s5, 6144 }
  0xc5   : > { %p1891_p4 = scmp.ne.s32.totalorder %s2507_s27, %s1890_s16  ;;  %p1896_p5 = scmp.lt.u32.totalorder %s2507_s27, %s2731_s5 }
  0xc6   : > { %p1897_p8 = scmp.lt.u32.totalorder %s1895_s23, %s1890_s16  ;;  %p1899_p13 = scmp.lt.u32.totalorder %s1890_s16, %s2507_s27 }
  0xc7   : > { %p1893_p9 = pnand %p1891_p4, %p2812_p2 }
  0xc8   : > { %p1898_p12 = por %p1897_p8, %p1896_p5 }
  0xc9   : > { %p1894_p3 = pneg %p1893_p9 }
  0xca   : > { %p1900_p1 = por %p1899_p13, %p1898_p12 }
  0xcc   : > { %p1901_p0 = pnand %p1900_p1, %p1894_p3 }
  0xce   : > { %1904 = shalt.err (!%p1901_p0)
}
  0xcf   : > { %s1905_s20 = scalar_lea.vmem %s2511_s9, 2048  ;;  %s2102_s10 = smov [#allocation13]  }
  0xd0   : > { %p1906_p11 = scmp.ne.s32.totalorder %s2511_s9, %s1905_s20  ;;  %s1910_s15 = sshll.u32 %s2102_s10, 4  ;;  %s1911_s15 = int_to_ptr.vmem [resolvable:$false] %s1910_s15 }
  0xd1   : > { %s1912_s25 = scalar_lea.vmem %s1911_s15, 4096  ;;  %p1913_p4 = scmp.lt.s32.totalorder %s2511_s9, %s1911_s15 }
  0xd2   : > { %p1908_p6 = pnand %p1906_p11, %p2812_p2  ;;  %p1914_p9 = scmp.lt.s32.totalorder %s1912_s25, %s1905_s20 }
  0xd4   : > { %p1909_p7 = pneg %p1908_p6  ;;  %p1915_p5 = por %p1914_p9, %p1913_p4 }
  0xd6   : > { %p1916_p8 = pnand %p1915_p5, %p1909_p7 }
  0xd8   : > { %1919 = shalt.err (!%p1916_p8)
}
  0xd9   : > { %1591 = dma.hbm_to_vmem [thread:$0]  (!%p2813_p10), %s2507_s27, 2048, %s2511_s9, %s424_s6, %s2100_s19, %s2100_s19, %s2101_s21  }
  0xda   : > { %s2814_s1 = sld [smem:[#allocation41_spill]] }
  0xe0   : > { %p2815_p2 = scmp.ne.s32.totalorder %s2814_s1, 0 }
  0xe1   : > { %s2816_s30 = sld [smem:[#allocation28_spill]] (!%p2815_p2)  ;;  %s2817_s3 = sld [smem:[#allocation35_spill]] (!%p2815_p2) }
  0xe2   : > { %446 = sbr.rel (%p2815_p2) target bundleno = 791 (0x317), region = 52 }
  0xe7   : > { %s2543_s13 = sand.u32 (!%p2815_p2), 1, %s2816_s30   ;;  %p2818_p3 = scmp.ne.s32.totalorder (!%p2815_p2), %s2817_s3, 0 }
  0xe8   : > { %s1439_s8 = sshll.u32 (!%p2815_p2), %s2543_s13, 2  ;;  %s449_s28 = scalar_lea.sflag (!%p2815_p2), [#allocation5], %s2543_s13 }
  0xe9   : > { %s2547_s24 = scalar_lea.vmem [#allocation4], %s1439_s8 }
  0xea   : > { %2021 = dma.done.wait (%p2818_p3), %s449_s28, 64  }
  0xeb   : > { %2023 = vsyncadd (%p2818_p3), %s449_s28, 4294967232  ;;  %s2819_s7 = sld [smem:[#allocation32_spill]]  ;;  %s2554_s27 = scalar_lea.vmem [#allocation7], %s1439_s8 }
  0xf1   : > { %s457_s19 = sand.u32 1, %s2819_s7  }
  0xf2   : > { %s458_s21 = scalar_lea.sflag [#allocation8], %s457_s19 }
  0xf3   : > { %2025 = dma.done.wait (%p2818_p3), %s458_s21, 64  }
  0xf4   : > { %2027 = vsyncadd (%p2818_p3), %s458_s21, 4294967232  ;;  %s2820_s26 = sld [smem:[#allocation25_spill]]  ;;  %s2821_s9 = sld [smem:[#allocation38_spill]] }
  0xfa   : > { %s468_s6 = sand.u32 1, %s2820_s26   ;;  %p2822_p10 = scmp.ne.s32.totalorder %s2821_s9, 0 }
  0xfb   : > { %s1441_s16 = sshll.u32 %s468_s6, 5 }
  0xfc   : > { %s2561_s22 = scalar_lea.vmem [#allocation9], %s1441_s16 }
  0xfd   : > { %2029 = dma.done.wait (%p2822_p10), %s458_s21, 512  }
  0xfe   : > { %2031 = vsyncadd (%p2822_p10), %s458_s21, 4294966784  ;;  %s476_s11 = scalar_lea.sflag [#allocation11], %s457_s19  ;;  %s479_s23 = scalar_lea.vmem [#allocation10], %s1441_s16 }
  0xff   : > { %2033 = dma.done.wait (%p2822_p10), %s476_s11, 2560  }
 0x100   : > { %2035 = vsyncadd (%p2822_p10), %s476_s11, 4294964736  ;;  %s1443_s12 = sshll.u32 %s468_s6, 7  ;;  %s494_s20 = scalar_lea.sflag [#allocation14], %s468_s6 }
 0x101   : > { %s2571_s29 = scalar_lea.vmem [#allocation12], %s1443_s12  ;;  %s2573_s10 = scalar_lea.vmem [#allocation13], %s1443_s12 }
 0x102   : > { %2037 = dma.done.wait (%p2822_p10), %s494_s20, 2048  }
 0x103   : > { %2039 = vsyncadd (%p2822_p10), %s494_s20, 4294965248  ;;  %s1445_s15 = sshll.u32 %s2543_s13, 3  ;;  %s2823_s30 = sld [smem:[#allocation29_spill]] }
 0x104   : > { %s2580_s25 = scalar_lea.vmem [#allocation15], %s1445_s15  ;;  %s2582_s1 = scalar_lea.vmem [#allocation16], %s1445_s15 }
 0x109   : > { %p1447_p12 = scmp.ne.s32.totalorder %s2823_s30, 0 }
 0x10a   : > { %v2103_v0 = vmov (!%p1447_p12), 0.0  }
 0x10b   : > { %570 = sbr.rel (%p1447_p12) target bundleno = 274 (0x112), region = 80  ;;  %571 = vst [vmem:[#allocation2] sm:$0xff] (!%p1447_p12), %v2103_v0  ;;  %572 = vst [vmem:[#allocation3] sm:$0xff] (!%p1447_p12), %v2103_v0 }
 0x112 PF: > { %v1696_v1 = vld [vmem:[%s479_s23 + $0x4] ss:$8 sps:$4 sm:$0xff]   ;;  %v1698_v2 = vld [vmem:[%s479_s23] ss:$8 sps:$4 sm:$0xff]   ;;  %v2104_v3 = vmov 0   ;;  %vm603_vm0 = vcmask 261120  }
 0x113   : > { %639 = vmatprep.mubr.bf16.mxu0 %v2104_v3  ;;  %683 = vmatprep.mubr.bf16.mxu1 %v2104_v3  ;;  %v1699_v4 = vld [vmem:[%s479_s23 + $0x14] ss:$8 sps:$4 sm:$0xff]   ;;  %v1701_v5 = vld [vmem:[%s479_s23 + $0x10] ss:$8 sps:$4 sm:$0xff]   ;;  %v1704_v6 = vld [vmem:[%s2561_s22 + $0x4] ss:$8 sps:$4 sm:$0xff]  }
 0x114   : > { %607 = vmatprep.subr.bf16.mxu0 %v1696_v1  ;;  %651 = vmatprep.subr.bf16.mxu1 %v1696_v1  ;;  %v573_v7 = vld [vmem:[%s2547_s24] sm:$0xf]  ;;  %v574_v8 = vld [vmem:[%s2554_s27] sm:$0xf]  ;;  %v1702_v9 = vld [vmem:[%s2561_s22] ss:$8 sps:$4 sm:$0xff]  }
 0x115   : > { %608 = vmatpush1.bf16.msra.mxu0 %v1698_v2  ;;  %652 = vmatpush1.bf16.msra.mxu1 %v1698_v2  ;;  %v1707_v10 = vld [vmem:[%s2561_s22 + $0x14] ss:$8 sps:$4 sm:$0xff]   ;;  %v1705_v11 = vld [vmem:[%s2561_s22 + $0x10] ss:$8 sps:$4 sm:$0xff]   ;;  %v1708_v12 = vld [vmem:[%s2571_s29 + $0x40] sm:$0xff]   ;;  %s2824_s3 = sld [smem:[#allocation29_spill]] }
 0x116   : > { %609 = vmatprep.subr.bf16.mxu0 %v1699_v4  ;;  %653 = vmatprep.subr.bf16.mxu1 %v1699_v4  ;;  %v1709_v13 = vld [vmem:[%s2573_s10 + $0x40] sm:$0xff]   ;;  %v1712_v16 = vld [vmem:[%s2571_s29 + $0x48] sm:$0xff]   ;;  %v1716_v20 = vld [vmem:[%s2571_s29 + $0x50] sm:$0xff]  }
 0x117   : > { %v1710_v14 = vld [vmem:[%s2571_s29] sm:$0xff]   ;;  %v1713_v17 = vld [vmem:[%s2573_s10 + $0x48] sm:$0xff]   ;;  %v1717_v21 = vld [vmem:[%s2573_s10 + $0x50] sm:$0xff]  }
 0x118   : > { %v1711_v15 = vld [vmem:[%s2573_s10] sm:$0xff]   ;;  %v1714_v18 = vld [vmem:[%s2571_s29 + $0x8] sm:$0xff]   ;;  %v1718_v22 = vld [vmem:[%s2571_s29 + $0x10] sm:$0xff]  }
 0x119   : > { %610 = vmatpush1.bf16.msra.mxu0 %v1701_v5  ;;  %654 = vmatpush1.bf16.msra.mxu1 %v1701_v5  ;;  %v1715_v19 = vld [vmem:[%s2573_s10 + $0x8] sm:$0xff]   ;;  %v1719_v23 = vld [vmem:[%s2573_s10 + $0x10] sm:$0xff]   ;;  %v1720_v24 = vld [vmem:[%s2571_s29 + $0x58] sm:$0xff]  }
 0x11a   : > { %712 = vmatprep.subr.bf16.mxu0 %v1704_v6  ;;  %753 = vmatprep.subr.bf16.mxu1 %v1704_v6  ;;  %v1721_v25 = vld [vmem:[%s2573_s10 + $0x58] sm:$0xff]   ;;  %v1724_v28 = vld [vmem:[%s2571_s29 + $0x60] sm:$0xff]   ;;  %v1728_v32 = vld [vmem:[%s2571_s29 + $0x68] sm:$0xff]  }
 0x11b   : > { %v1722_v26 = vld [vmem:[%s2571_s29 + $0x18] sm:$0xff]   ;;  %v1725_v29 = vld [vmem:[%s2573_s10 + $0x60] sm:$0xff]   ;;  %v1729_v33 = vld [vmem:[%s2573_s10 + $0x68] sm:$0xff]   ;;  %p1492_p13 = scmp.ne.s32.totalorder %s2824_s3, 2 }
 0x11c   : > { %1452 = vmatmul.mubr.msk.bf16.vlgmr.msra.gmra.mrb[0].mxu0 %vm603_vm0, %v573_v7  ;;  %1453 = vmatmul.mubr.msk.bf16.vlgmr.msra.gmra.mrb[0].mxu1 %vm603_vm0, %v574_v8  ;;  %v1723_v27 = vld [vmem:[%s2573_s10 + $0x18] sm:$0xff]   ;;  %v1726_v30 = vld [vmem:[%s2571_s29 + $0x20] sm:$0xff]   ;;  %v1730_v34 = vld [vmem:[%s2571_s29 + $0x28] sm:$0xff]   ;;  %s2825_s24 = sld [smem:[#allocation44_spill]] (!%p1492_p13)  ;;  %s2826_s21 = sld [smem:[#allocation45_spill]] (!%p1492_p13) }
 0x11d   : > { %713 = vmatpush1.bf16.msra.mxu0 %v1702_v9  ;;  %754 = vmatpush1.bf16.msra.mxu1 %v1702_v9  ;;  %v1727_v31 = vld [vmem:[%s2573_s10 + $0x20] sm:$0xff]   ;;  %v1731_v35 = vld [vmem:[%s2573_s10 + $0x28] sm:$0xff]   ;;  %v1732_v36 = vld [vmem:[%s2571_s29 + $0x70] sm:$0xff]  }
 0x11e   : > { %714 = vmatprep.subr.bf16.mxu0 %v1707_v10  ;;  %755 = vmatprep.subr.bf16.mxu1 %v1707_v10  ;;  %v1733_v37 = vld [vmem:[%s2573_s10 + $0x70] sm:$0xff]   ;;  %v1736_v40 = vld [vmem:[%s2571_s29 + $0x78] sm:$0xff]   ;;  %v794_v58 = vld [vmem:[#allocation2] sm:$0xff] }
 0x11f   : > { %744 = vmatprep.mubr.bf16.mxu0 %v2104_v3  ;;  %785 = vmatprep.mubr.bf16.mxu1 %v2104_v3  ;;  %v1734_v38 = vld [vmem:[%s2571_s29 + $0x30] sm:$0xff]   ;;  %v1737_v41 = vld [vmem:[%s2573_s10 + $0x78] sm:$0xff]   ;;  %v967_v60 = vld [vmem:[#allocation3] sm:$0xff] }
 0x120   : > { %v1735_v39 = vld [vmem:[%s2573_s10 + $0x30] sm:$0xff]   ;;  %v1738_v42 = vld [vmem:[%s2571_s29 + $0x38] sm:$0xff]  }
 0x121   : > { %715 = vmatpush1.bf16.msra.mxu0 %v1705_v11  ;;  %756 = vmatpush1.bf16.msra.mxu1 %v1705_v11  ;;  %v1739_v43 = vld [vmem:[%s2573_s10 + $0x38] sm:$0xff]  }
 0x122   : > { %1505 = vmatprep.subr.bf16.mxu0 %v1708_v12  ;;  %1527 = vmatprep.subr.bf16.mxu1 %v1709_v13  ;;  %v1494_v10 = vld [vmem:[%s2826_s21] ss:$0 sm:$0xff] (!%p1492_p13) }
 0x128   : > { %1458 = vmatmul.mubr.msk.bf16.vlgmr.msra.gmra.mrb[0].mxu0 %vm603_vm0, %v573_v7  ;;  %1459 = vmatmul.mubr.msk.bf16.vlgmr.msra.gmra.mrb[0].mxu1 %vm603_vm0, %v574_v8  ;;  %v1493_v7 = vld [vmem:[%s2825_s24] ss:$0 sm:$0xff] (!%p1492_p13) }
 0x129   : > { %1506 = vmatpush3.bf16.msra.mxu0 %v1710_v14  ;;  %1528 = vmatpush3.bf16.msra.mxu1 %v1711_v15 }
 0x12a   : > { %1507 = vmatprep.subr.bf16.mxu0 %v1712_v16  ;;  %1529 = vmatprep.subr.bf16.mxu1 %v1713_v17 }
 0x12d   : > { %1508 = vmatpush3.bf16.msra.mxu0 %v1714_v18  ;;  %1530 = vmatpush3.bf16.msra.mxu1 %v1715_v19 }
 0x12e   : > { %1509 = vmatprep.subr.bf16.mxu0 %v1716_v20  ;;  %1531 = vmatprep.subr.bf16.mxu1 %v1717_v21 }
 0x131   : > { %1510 = vmatpush3.bf16.msra.mxu0 %v1718_v22  ;;  %1532 = vmatpush3.bf16.msra.mxu1 %v1719_v23 }
 0x132   : > { %1511 = vmatprep.subr.bf16.mxu0 %v1720_v24  ;;  %1533 = vmatprep.subr.bf16.mxu1 %v1721_v25 }
 0x135   : > { %1512 = vmatpush3.bf16.msra.mxu0 %v1722_v26  ;;  %1534 = vmatpush3.bf16.msra.mxu1 %v1723_v27 }
 0x136   : > { %1513 = vmatprep.subr.bf16.mxu0 %v1724_v28  ;;  %1535 = vmatprep.subr.bf16.mxu1 %v1725_v29 }
 0x139   : > { %1514 = vmatpush3.bf16.msra.mxu0 %v1726_v30  ;;  %1536 = vmatpush3.bf16.msra.mxu1 %v1727_v31 }
 0x13a   : > { %1515 = vmatprep.subr.bf16.mxu0 %v1728_v32  ;;  %1537 = vmatprep.subr.bf16.mxu1 %v1729_v33 }
 0x13d   : > { %1516 = vmatpush3.bf16.msra.mxu0 %v1730_v34  ;;  %1538 = vmatpush3.bf16.msra.mxu1 %v1731_v35 }
 0x13e   : > { %1517 = vmatprep.subr.bf16.mxu0 %v1732_v36  ;;  %1539 = vmatprep.subr.bf16.mxu1 %v1733_v37 }
 0x141   : > { %1518 = vmatpush3.bf16.msra.mxu0 %v1734_v38  ;;  %1540 = vmatpush3.bf16.msra.mxu1 %v1735_v39 }
 0x142   : > { %1519 = vmatprep.subr.bf16.mxu0 %v1736_v40  ;;  %1541 = vmatprep.subr.bf16.mxu1 %v1737_v41 }
 0x145   : > { %1520 = vmatpush3.bf16.msra.mxu0 %v1738_v42  ;;  %1542 = vmatpush3.bf16.msra.mxu1 %v1739_v43 }
 0x1fb   : > { %v746_v44 = vpop.f32.mrb[0].mxu0  ;;  %v787_v45 = vpop.f32.mrb[0].mxu1 }
 0x1fc   : > { %v748_v46 = vpop.f32.mrb[1].mxu0  ;;  %v789_v47 = vpop.f32.mrb[1].mxu1  ;;  %v795_v52 = vpack.c.bf16 %v746_v44, %v746_v44  ;;  %v968_v53 = vpack.c.bf16 %v787_v45, %v787_v45 }
 0x1fd   : > { %v796_v48 = vpack.c.bf16 %v748_v46, %v748_v46  ;;  %v969_v49 = vpack.c.bf16 %v789_v47, %v789_v47  ;;  %v750_v50 = vpop.f32.mrb[2].mxu0  ;;  %v791_v51 = vpop.f32.mrb[2].mxu1 }
 0x1fe   : > { %v751_v54 = vpop.f32.mrb[3].mxu0  ;;  %v792_v55 = vpop.f32.mrb[3].mxu1 }
 0x1ff   : > { %957 = vmatprep.mubr.bf16.mxu0 %v796_v48  ;;  %1130 = vmatprep.mubr.bf16.mxu1 %v969_v49 }
 0x200   : > { %958 = vmatmul.mubr.bf16.vlgmr.msra.gmra.mrb[4].mxu0 %v795_v52  ;;  %1131 = vmatmul.mubr.bf16.vlgmr.msra.gmra.mrb[4].mxu1 %v968_v53 }
 0x2d3   : > { %v1521_v56 = vpop.f32.mrb[4].mxu0  ;;  %v1543_v57 = vpop.f32.mrb[4].mxu1  ;;  %1143 = sbr.rel (%p1492_p13) target bundleno = 740 (0x2e4), region = 84 }
 0x2d4   : > { %v1522_v59 = vpop.f32.mrb[5].mxu0  ;;  %v1544_v61 = vpop.f32.mrb[5].mxu1 }
 0x2d5   : > { %v1523_v62 = vadd.f32 %v1522_v59, %v1521_v56  ;;  %v1545_v63 = vadd.f32 %v1544_v61, %v1543_v57  ;;  %v1524_v0 = vpop.f32.mrb[6].mxu0  ;;  %v1546_v1 = vpop.f32.mrb[6].mxu1 }
 0x2d6   : > { %v1525_v2 = vpop.f32.mrb[7].mxu0  ;;  %v1547_v3 = vpop.f32.mrb[7].mxu1 }
 0x2d7   : > { %v965_v4 = vadd.f32 %v1523_v62, %v794_v58  ;;  %v1138_v5 = vadd.f32 %v1545_v63, %v967_v60 }
 0x2d9   : > { %966 = vst [vmem:[#allocation2] sm:$0xff] %v965_v4  ;;  %1139 = vst [vmem:[#allocation3] sm:$0xff] %v1138_v5 }
 0x2e0   : > { %v1144_v6 = vld [vmem:[#allocation2] sm:$0xff]  ;;  %v1154_v8 = vld [vmem:[#allocation3] sm:$0xff] }
 0x2e1   : > { %v1152_v9 = vadd.f32 %v1493_v7, %v1144_v6  ;;  %v1162_v11 = vadd.f32 %v1494_v10, %v1154_v8 }
 0x2e3   : > { %1153 = vst [vmem:[%s2580_s25] sm:$0xff] %v1152_v9  ;;  %1163 = vst [vmem:[%s2582_s1] sm:$0xff] %v1162_v11 }
 0x2e4 PF: > { %s2827_s27 = sld [smem:[#allocation30_spill]]  ;;  %s2828_s26 = sld [smem:[#allocation39_spill]] }
 0x2e5   : > { %s2829_s22 = sld [smem:[#allocation46_spill]]  ;;  %s1183_s23 = sshll.u32 %s2580_s25, 4  ;;  %s1184_s23 = int_to_ptr.vmem [resolvable:$true] %s1183_s23 }
 0x2e6   : > { %s1165_s12 = scalar_lea.sflag [#allocation6], %s2543_s13  ;;  %s1920_s29 = scalar_lea.vmem %s1184_s23, 128 }
 0x2e7   : > { %p1921_p1 = scmp.ne.s32.totalorder %s1184_s23, %s1920_s29  ;;  %s2105_s20 = smov [#allocation15]  }
 0x2e8   : > { %s1924_s10 = sshll.u32 %s2105_s20, 4  ;;  %s1925_s10 = int_to_ptr.vmem [resolvable:$false] %s1924_s10 }
 0x2e9   : > { %s1926_s15 = scalar_lea.vmem %s1925_s10, 256  ;;  %p1927_p7 = scmp.lt.s32.totalorder %s1184_s23, %s1925_s10 }
 0x2ea   : > { %s1497_s9 = sshll.u32 %s2827_s27, 7  ;;  %p2830_p0 = scmp.ne.s32.totalorder %s2828_s26, 0 }
 0x2eb   : > { %s2642_s11 = scalar_lea.hbm %s2829_s22, %s1497_s9  ;;  %p1928_p4 = scmp.lt.s32.totalorder %s1926_s15, %s1920_s29 }
 0x2ec   : > { %p1922_p11 = pnand %p1921_p1, %p2830_p0 }
 0x2ed   : > { %p1929_p9 = por %p1928_p4, %p1927_p7 }
 0x2ee   : > { %p1923_p6 = pneg %p1922_p11 }
 0x2f0   : > { %p1930_p5 = pnand %p1929_p9, %p1923_p6 }
 0x2f2   : > { %1933 = shalt.err (!%p1930_p5)
}
 0x2f3   : > { %s1934_s25 = scalar_lea.hbm %s2642_s11, 128  ;;  %s1938_s8 = scalar_lea.hbm %s2829_s22, 256 }
 0x2f4   : > { %p1935_p8 = scmp.ne.s32.totalorder %s2642_s11, %s1934_s25  ;;  %p1939_p10 = scmp.lt.u32.totalorder %s2642_s11, %s2829_s22 }
 0x2f5   : > { %p1940_p12 = scmp.lt.u32.totalorder %s1938_s8, %s1934_s25  ;;  %p1942_p1 = scmp.lt.u32.totalorder %s1934_s25, %s2642_s11 }
 0x2f6   : > { %p1936_p2 = pnand %p1935_p8, %p2830_p0 }
 0x2f7   : > { %p1941_p13 = por %p1940_p12, %p1939_p10 }
 0x2f8   : > { %p1937_p3 = pneg %p1936_p2 }
 0x2f9   : > { %p1943_p11 = por %p1942_p1, %p1941_p13 }
 0x2fb   : > { %p1944_p6 = pnand %p1943_p11, %p1937_p3 }
 0x2fd   : > { %1947 = shalt.err (!%p1944_p6)
}
 0x2fe   : > { %1569 = dma.vmem_to_hbm [thread:$0]  (%p2830_p0), %s1184_s23, 128, %s2642_s11, %s1165_s12  }
 0x2ff   : > { %s2831_s21 = sld [smem:[#allocation47_spill]]  ;;  %s1196_s16 = sshll.u32 %s2582_s1, 4  ;;  %s1197_s16 = int_to_ptr.vmem [resolvable:$true] %s1196_s16 }
 0x300   : > { %s1170_s29 = scalar_lea.sflag [#allocation17], %s2543_s13  ;;  %s1948_s20 = scalar_lea.vmem %s1197_s16, 128 }
 0x301   : > { %p1949_p7 = scmp.ne.s32.totalorder %s1197_s16, %s1948_s20  ;;  %s2106_s10 = smov [#allocation16]  }
 0x302   : > { %s1952_s15 = sshll.u32 %s2106_s10, 4  ;;  %s1953_s15 = int_to_ptr.vmem [resolvable:$false] %s1952_s15 }
 0x303   : > { %p1950_p4 = pnand %p1949_p7, %p2830_p0  ;;  %s1954_s25 = scalar_lea.vmem %s1953_s15, 256 }
 0x304   : > { %p1955_p5 = scmp.lt.s32.totalorder %s1197_s16, %s1953_s15  ;;  %p1956_p8 = scmp.lt.s32.totalorder %s1954_s25, %s1948_s20 }
 0x305   : > { %s2668_s6 = scalar_lea.hbm %s2831_s21, %s1497_s9  ;;  %p1951_p9 = pneg %p1950_p4 }
 0x306   : > { %p1957_p2 = por %p1956_p8, %p1955_p5 }
 0x308   : > { %p1958_p3 = pnand %p1957_p2, %p1951_p9 }
 0x30a   : > { %1961 = shalt.err (!%p1958_p3)
}
 0x30b   : > { %s1962_s13 = scalar_lea.hbm %s2668_s6, 128  ;;  %s1966_s9 = scalar_lea.hbm %s2831_s21, 256 }
 0x30c   : > { %p1963_p10 = scmp.ne.s32.totalorder %s2668_s6, %s1962_s13  ;;  %p1967_p1 = scmp.lt.u32.totalorder %s2668_s6, %s2831_s21 }
 0x30d   : > { %p1968_p11 = scmp.lt.u32.totalorder %s1966_s9, %s1962_s13  ;;  %p1970_p7 = scmp.lt.u32.totalorder %s1962_s13, %s2668_s6 }
 0x30e   : > { %p1964_p12 = pnand %p1963_p10, %p2830_p0 }
 0x30f   : > { %p1969_p6 = por %p1968_p11, %p1967_p1 }
 0x310   : > { %p1965_p13 = pneg %p1964_p12 }
 0x311   : > { %p1971_p4 = por %p1970_p7, %p1969_p6 }
 0x313   : > { %p1972_p9 = pnand %p1971_p4, %p1965_p13 }
 0x315   : > { %1975 = shalt.err (!%p1972_p9)
}
 0x316   : > { %1570 = dma.vmem_to_hbm [thread:$0]  (%p2830_p0), %s1197_s16, 128, %s2668_s6, %s1170_s29  }
 0x317 PF: > { %s2832_s12 = sld [smem:[#allocation31_spill]]  ;;  %s2833_s30 = sld [smem:[#allocation27_spill]] }
 0x318   : > { %s2834_s3 = sld [smem:[#allocation40_spill]] }
 0x31d   : > { %p1600_p5 = scmp.ge.s32.totalorder %s2832_s12, 2  ;;  %s1208_s8 = sand.u32 1, %s2833_s30  }
 0x31e   : > { %p2835_p8 = scmp.ne.s32.totalorder %s2834_s3, 0  ;;  %s1209_s28 = scalar_lea.sflag [#allocation6], %s1208_s8 }
 0x320   : > { %p1593_p2 = pnand %p1600_p5, %p2835_p8 }
 0x322   : > { %2041 = dma.done.wait (!%p1593_p2), %s1209_s28, 128  }
 0x323   : > { %2043 = vsyncadd (!%p1593_p2), %s1209_s28, 4294967168  ;;  %s1218_s24 = scalar_lea.sflag [#allocation17], %s1208_s8 }
 0x324   : > { %2045 = dma.done.wait (!%p1593_p2), %s1218_s24, 128  }
 0x325   : > { %2047 = vsyncadd (!%p1593_p2), %s1218_s24, 4294967168  ;;  %s38_s19 = sadd.s32 1, %s2832_s12   ;;  %s2836_s30 = sld [smem:[#allocation25_spill]] }
 0x326   : > { %p35_p3 = scmp.ge.s32.totalorder %s38_s19, 8   ;;  %s2837_s10 = sld [smem:[#allocation26_spill]] }
 0x327   : > { %s2838_s11 = sld [smem:[#allocation36_spill]]  ;;  %s2839_s12 = sld [smem:[#allocation28_spill]] }
 0x328   : > { %s2840_s26 = sld [smem:[#allocation37_spill]]  ;;  %s2841_s7 = sld [smem:[#allocation33_spill]] }
 0x329   : > { %s2842_s6 = sld [smem:[#allocation34_spill]]  ;;  %s2843_s13 = smov %s2070_s14 }
 0x32a   : > { %s2845_s15 = smov %s2082_s17  ;;  %s2846_s16 = smov %s2086_s18 }
 0x32b   :  { %37 = sbr.rel (!%p35_p3) target bundleno = 24 (0x18), region = 183 }
 0x32e   : > { %s2844_s14 = smov %s2840_s26  ;;  %s2847_s17 = smov %s2841_s7 }
 0x32f   : > { %s2848_s18 = smov %s2842_s6 }
 0x332   :  { %1223 = vsyncpa [#allocation5], 1 }
 0x333   :  { %1225 = vsyncpa [#allocation5 + $0x1], 1 }
 0x334   :  { %1226 = vsyncpa [#allocation8], 1 }
 0x335   :  { %1228 = vsyncpa [#allocation8 + $0x1], 1 }
 0x336   :  { %1229 = vsyncpa [#allocation11], 1 }
 0x337   :  { %1231 = vsyncpa [#allocation11 + $0x1], 1 }
 0x338   :  { %1232 = vsyncpa [#allocation14], 1 }
 0x339   :  { %1234 = vsyncpa [#allocation14 + $0x1], 1 }
 0x33a   :  { %1235 = vsyncpa [#allocation6], 1 }
 0x33b   :  { %1237 = vsyncpa [#allocation6 + $0x1], 1 }
 0x33c   :  { %1238 = vsyncpa [#allocation17], 1 }
 0x33d   :  { %1240 = vsyncpa [#allocation17 + $0x1], 1 }

</bundles_post_ra>
